<compile_context>
chip_gen: v7x
topology: tpu7x:2x2x1
jax: 0.10.0
libtpu: 0.0.40
codegen_flags: <defaults>
</compile_context>

<pallas_src>
import functools

import jax
import jax.numpy as jnp
from jax.experimental import pallas as pl
from jax.experimental.pallas import tpu as pltpu


def rnn_chunk_kernel(x_ref, wx_ref, b_ref, wh_ref, wy_ref, by_ref,
                     y_ref, h_state, h_chunk):
    """One grid step = CHUNK RNN time steps.

    x_ref:   (batch, CHUNK, input_dim)   current chunk of inputs
    wx_ref:  (input_dim, hidden)         Wx (pre-transposed for x @ W)
    b_ref:   (1, hidden)                 bx + bh folded
    wh_ref:  (hidden, hidden)            Wh
    wy_ref:  (hidden, output_dim)        Wy
    by_ref:  (1, output_dim)             by
    y_ref:   (batch, CHUNK, output_dim)  output chunk
    h_state: VMEM (batch, hidden)        hidden state carried across chunks
    h_chunk: VMEM (batch, CHUNK, hidden) per-step hidden states of this chunk
    """
    c = pl.program_id(0)

    @pl.when(c == 0)
    def _():
        # init_hidden(option=1): zeros(batch, hidden_dim)
        h_state[...] = jnp.zeros_like(h_state)

    B, T, In = x_ref.shape
    H = wh_ref.shape[0]

    # --- Hoisted input projection: one MXU pass for the whole chunk -------
    x2 = x_ref[...].reshape(B * T, In)
    p = jnp.dot(x2, wx_ref[...], preferred_element_type=jnp.float32) + b_ref[...]
    p = p.reshape(B, T, H)

    # --- Sequential recurrence (only h @ Wh remains per step) -------------
    h = h_state[...]
    for i in range(T):  # static trip count -> fully unrolled, static indices
        h = jnp.tanh(p[:, i, :] +
                     jnp.dot(h, wh_ref[...], preferred_element_type=jnp.float32))
        h_chunk[:, i, :] = h
    h_state[...] = h

    # --- Hoisted output projection: one matmul + one slab store per chunk -
    h2 = h_chunk[...].reshape(B * T, H)
    y = jnp.dot(h2, wy_ref[...], preferred_element_type=jnp.float32) + by_ref[...]
    y_ref[...] = y.reshape(B, T, -1).astype(y_ref.dtype)


_CHUNK = 8  # timesteps per grid step (multiple of 8 -> sublane-aligned blocks)


@jax.jit
def rnn_forward(x, wx, bx, wh, bh, wy, by):
    """x: (batch, seq, input_dim) float32. Returns (batch, seq, output_dim)."""
    batch, seq, input_dim = x.shape
    hidden_dim = wx.shape[1]
    output_dim = wy.shape[1]

    # Pad the sequence to a multiple of the time chunk (zeros; extra outputs
    # are sliced off below and do not affect the real timesteps).
    seq_pad = pl.cdiv(seq, _CHUNK) * _CHUNK
    x_p = x if seq_pad == seq else jnp.pad(x, ((0, 0), (0, seq_pad - seq), (0, 0)))

    # Fold the two recurrence biases into one; biases as (1, dim) rows.
    b_comb = (bx + bh).reshape(1, hidden_dim)
    by2 = by.reshape(1, output_dim)

    const = lambda shape: pl.BlockSpec(shape, lambda c: tuple(0 for _ in shape))

    y_pad = pl.pallas_call(
        rnn_chunk_kernel,
        out_shape=jax.ShapeDtypeStruct((batch, seq_pad, output_dim), jnp.float32),
        grid_spec=pltpu.PrefetchScalarGridSpec(
            num_scalar_prefetch=0,
            grid=(seq_pad // _CHUNK,),
            in_specs=[
                pl.BlockSpec((batch, _CHUNK, input_dim), lambda c: (0, c, 0)),  # x chunk
                const((input_dim, hidden_dim)),    # Wx
                const((1, hidden_dim)),            # bx + bh
                const((hidden_dim, hidden_dim)),   # Wh
                const((hidden_dim, output_dim)),   # Wy
                const((1, output_dim)),            # by
            ],
            out_specs=pl.BlockSpec((batch, _CHUNK, output_dim), lambda c: (0, c, 0)),
            scratch_shapes=[
                pltpu.VMEM((batch, hidden_dim), jnp.float32),          # carried h
                pltpu.VMEM((batch, _CHUNK, hidden_dim), jnp.float32),  # chunk h's
            ],
        ),
        compiler_params=pltpu.CompilerParams(
            dimension_semantics=("arbitrary",),  # recurrence serializes time chunks
        ),
    )(x_p, wx, b_comb, wh, wy, by2)

    return y_pad if seq_pad == seq else y_pad[:, :seq, :]


def rnn_forward_ref(x, wx, bx, wh, bh, wy, by):
    """Pure-JAX reference of the PyTorch forward (option=1)."""
    batch, seq, _ = x.shape
    hidden_dim = wx.shape[1]
    h = jnp.zeros((batch, hidden_dim), jnp.float32)
    ys = []
    for t in range(seq):
        h = jnp.tanh(x[:, t, :] @ wx + bx + h @ wh + bh)
        ys.append(h @ wy + by)
    return jnp.stack(ys, axis=1)


def init_linear(key, fan_in, fan_out):
    """Deterministic nn.Linear-style init: U(-1/sqrt(fan_in), 1/sqrt(fan_in)).
    Returned weight is already transposed to (fan_in, fan_out) for x @ W."""
    kw, kb = jax.random.split(key)
    bound = 1.0 / jnp.sqrt(fan_in)
    w = jax.random.uniform(kw, (fan_in, fan_out), jnp.float32, -bound, bound)
    b = jax.random.uniform(kb, (fan_out,), jnp.float32, -bound, bound)
    return w, b


if __name__ == "__main__":
    batch_size, seq_len = 2, 8
    input_dim, hidden_dim, output_dim = 16, 32, 8

    key = jax.random.PRNGKey(0)
    kx, kwx, kwh, kwy = jax.random.split(key, 4)

    x = jax.random.normal(kx, (batch_size, seq_len, input_dim), jnp.float32)
    wx, bx = init_linear(kwx, input_dim, hidden_dim)   # RNNCell.Wx
    wh, bh = init_linear(kwh, hidden_dim, hidden_dim)  # RNNCell.Wh
    wy, by = init_linear(kwy, hidden_dim, output_dim)  # RNNCell.Wy

    out = rnn_forward(x, wx, bx, wh, bh, wy, by)
    out = jax.block_until_ready(out)

    ref = rnn_forward_ref(x, wx, bx, wh, bh, wy, by)
    assert out.shape == (batch_size, seq_len, output_dim)
    assert jnp.allclose(out, ref, atol=1e-5, rtol=1e-5)

    print("KERNEL_OK")
</pallas_src>

<mosaic_0001>
module attributes {stable_mosaic.version = 11 : i64} {
  func.func @rnn_chunk_kernel(%arg0: i32, %arg1: memref<2x8x16xf32, #tpu.memory_space<vmem>>, %arg2: memref<16x32xf32, #tpu.memory_space<vmem>>, %arg3: memref<1x32xf32, #tpu.memory_space<vmem>>, %arg4: memref<32x32xf32, #tpu.memory_space<vmem>>, %arg5: memref<32x8xf32, #tpu.memory_space<vmem>>, %arg6: memref<1x8xf32, #tpu.memory_space<vmem>>, %arg7: memref<2x8x8xf32, #tpu.memory_space<vmem>>, %arg8: memref<2x32xf32, #tpu.memory_space<vmem>>, %arg9: memref<2x8x32xf32, #tpu.memory_space<vmem>>) attributes {dimension_semantics = [#tpu.dimension_semantics<arbitrary>], iteration_bounds = array<i64: 1>, scalar_prefetch = 0 : i64, scratch_operands = 2 : i64, tpu.core_type = #tpu.core_type<tc>, window_params = [{transform_indices = @transform_0, window_bounds = array<i64: 2, 8, 16>}, {pipeline_mode = #tpu.pipeline_mode<synchronous>, transform_indices = @transform_1, window_bounds = array<i64: 16, 32>}, {pipeline_mode = #tpu.pipeline_mode<synchronous>, transform_indices = @transform_2, window_bounds = array<i64: 1, 32>}, {pipeline_mode = #tpu.pipeline_mode<synchronous>, transform_indices = @transform_3, window_bounds = array<i64: 32, 32>}, {pipeline_mode = #tpu.pipeline_mode<synchronous>, transform_indices = @transform_4, window_bounds = array<i64: 32, 8>}, {pipeline_mode = #tpu.pipeline_mode<synchronous>, transform_indices = @transform_5, window_bounds = array<i64: 1, 8>}, {transform_indices = @transform_6, window_bounds = array<i64: 2, 8, 8>}]} {
    %c0_i32 = arith.constant 0 : i32
    %0 = arith.cmpi eq, %arg0, %c0_i32 : i32
    %1 = arith.extui %0 : i1 to i32
    %c0_i32_0 = arith.constant 0 : i32
    %2 = arith.cmpi ne, %1, %c0_i32_0 : i32
    scf.if %2 {
      %cst_63 = arith.constant 0.000000e+00 : f32
      %94 = vector.broadcast %cst_63 : f32 to vector<2x32xf32>
      %c0_64 = arith.constant 0 : index
      %c0_65 = arith.constant 0 : index
      %95 = vector.load %arg8[%c0_64, %c0_65] : memref<2x32xf32, #tpu.memory_space<vmem>>, vector<2x32xf32>
      tpu.vector_store %arg8[%c0_64, %c0_65], %94 {strides = array<i32>} : memref<2x32xf32, #tpu.memory_space<vmem>>, vector<2x32xf32>,
    } else {
    }
    %c0 = arith.constant 0 : index
    %c0_1 = arith.constant 0 : index
    %c0_2 = arith.constant 0 : index
    %3 = vector.load %arg1[%c0, %c0_1, %c0_2] : memref<2x8x16xf32, #tpu.memory_space<vmem>>, vector<2x8x16xf32>
    %4 = vector.shape_cast %3 : vector<2x8x16xf32> to vector<16x16xf32>
    %c0_3 = arith.constant 0 : index
    %c0_4 = arith.constant 0 : index
    %5 = vector.load %arg2[%c0_3, %c0_4] : memref<16x32xf32, #tpu.memory_space<vmem>>, vector<16x32xf32>
    %cst = arith.constant dense<0.000000e+00> : vector<16x32xf32>
    %6 = tpu.matmul %4, %5, %cst {dimension_numbers = #tpu.dot_dimension_numbers<[1], [0], [0], [1], [0, 0, 1, 1], [], []>} : vector<16x16xf32>, vector<16x32xf32>, vector<16x32xf32> -> vector<16x32xf32>
    %c0_5 = arith.constant 0 : index
    %c0_6 = arith.constant 0 : index
    %7 = vector.load %arg3[%c0_5, %c0_6] : memref<1x32xf32, #tpu.memory_space<vmem>>, vector<1x32xf32>
    %8 = vector.broadcast %7 : vector<1x32xf32> to vector<16x32xf32>
    %9 = arith.addf %6, %8 : vector<16x32xf32>
    %10 = vector.shape_cast %9 : vector<16x32xf32> to vector<2x8x32xf32>
    %c0_7 = arith.constant 0 : index
    %c0_8 = arith.constant 0 : index
    %11 = vector.load %arg8[%c0_7, %c0_8] : memref<2x32xf32, #tpu.memory_space<vmem>>, vector<2x32xf32>
    %12 = vector.extract_strided_slice %10 {offsets = [0, 0, 0], sizes = [2, 1, 32], strides = [1, 1, 1]} : vector<2x8x32xf32> to vector<2x1x32xf32>
    %13 = vector.shape_cast %12 : vector<2x1x32xf32> to vector<2x32xf32>
    %c0_9 = arith.constant 0 : index
    %c0_10 = arith.constant 0 : index
    %14 = vector.load %arg4[%c0_9, %c0_10] : memref<32x32xf32, #tpu.memory_space<vmem>>, vector<32x32xf32>
    %cst_11 = arith.constant dense<0.000000e+00> : vector<2x32xf32>
    %15 = tpu.matmul %11, %14, %cst_11 {dimension_numbers = #tpu.dot_dimension_numbers<[1], [0], [0], [1], [0, 0, 1, 1], [], []>} : vector<2x32xf32>, vector<32x32xf32>, vector<2x32xf32> -> vector<2x32xf32>
    %16 = arith.addf %13, %15 : vector<2x32xf32>
    %17 = math.tanh %16 : vector<2x32xf32>
    %c0_12 = arith.constant 0 : index
    %c0_13 = arith.constant 0 : index
    %c0_14 = arith.constant 0 : index
    %18 = vector.load %arg9[%c0_12, %c0_13, %c0_14] : memref<2x8x32xf32, #tpu.memory_space<vmem>>, vector<2x1x32xf32>
    %19 = vector.shape_cast %18 : vector<2x1x32xf32> to vector<2x32xf32>
    %20 = vector.shape_cast %17 : vector<2x32xf32> to vector<2x1x32xf32>
    tpu.vector_store %arg9[%c0_12, %c0_13, %c0_14], %20 {strides = array<i32>} : memref<2x8x32xf32, #tpu.memory_space<vmem>>, vector<2x1x32xf32>,
    %21 = vector.extract_strided_slice %10 {offsets = [0, 1, 0], sizes = [2, 1, 32], strides = [1, 1, 1]} : vector<2x8x32xf32> to vector<2x1x32xf32>
    %22 = vector.shape_cast %21 : vector<2x1x32xf32> to vector<2x32xf32>
    %c0_15 = arith.constant 0 : index
    %c0_16 = arith.constant 0 : index
    %23 = vector.load %arg4[%c0_15, %c0_16] : memref<32x32xf32, #tpu.memory_space<vmem>>, vector<32x32xf32>
    %cst_17 = arith.constant dense<0.000000e+00> : vector<2x32xf32>
    %24 = tpu.matmul %17, %23, %cst_17 {dimension_numbers = #tpu.dot_dimension_numbers<[1], [0], [0], [1], [0, 0, 1, 1], [], []>} : vector<2x32xf32>, vector<32x32xf32>, vector<2x32xf32> -> vector<2x32xf32>
    %25 = arith.addf %22, %24 : vector<2x32xf32>
    %26 = math.tanh %25 : vector<2x32xf32>
    %c0_18 = arith.constant 0 : index
    %c1 = arith.constant 1 : index
    %c0_19 = arith.constant 0 : index
    %27 = vector.load %arg9[%c0_18, %c1, %c0_19] : memref<2x8x32xf32, #tpu.memory_space<vmem>>, vector<2x1x32xf32>
    %28 = vector.shape_cast %27 : vector<2x1x32xf32> to vector<2x32xf32>
    %29 = vector.shape_cast %26 : vector<2x32xf32> to vector<2x1x32xf32>
    tpu.vector_store %arg9[%c0_18, %c1, %c0_19], %29 {strides = array<i32>} : memref<2x8x32xf32, #tpu.memory_space<vmem>>, vector<2x1x32xf32>,
    %30 = vector.extract_strided_slice %10 {offsets = [0, 2, 0], sizes = [2, 1, 32], strides = [1, 1, 1]} : vector<2x8x32xf32> to vector<2x1x32xf32>
    %31 = vector.shape_cast %30 : vector<2x1x32xf32> to vector<2x32xf32>
    %c0_20 = arith.constant 0 : index
    %c0_21 = arith.constant 0 : index
    %32 = vector.load %arg4[%c0_20, %c0_21] : memref<32x32xf32, #tpu.memory_space<vmem>>, vector<32x32xf32>
    %cst_22 = arith.constant dense<0.000000e+00> : vector<2x32xf32>
    %33 = tpu.matmul %26, %32, %cst_22 {dimension_numbers = #tpu.dot_dimension_numbers<[1], [0], [0], [1], [0, 0, 1, 1], [], []>} : vector<2x32xf32>, vector<32x32xf32>, vector<2x32xf32> -> vector<2x32xf32>
    %34 = arith.addf %31, %33 : vector<2x32xf32>
    %35 = math.tanh %34 : vector<2x32xf32>
    %c0_23 = arith.constant 0 : index
    %c2 = arith.constant 2 : index
    %c0_24 = arith.constant 0 : index
    %36 = vector.load %arg9[%c0_23, %c2, %c0_24] : memref<2x8x32xf32, #tpu.memory_space<vmem>>, vector<2x1x32xf32>
    %37 = vector.shape_cast %36 : vector<2x1x32xf32> to vector<2x32xf32>
    %38 = vector.shape_cast %35 : vector<2x32xf32> to vector<2x1x32xf32>
    tpu.vector_store %arg9[%c0_23, %c2, %c0_24], %38 {strides = array<i32>} : memref<2x8x32xf32, #tpu.memory_space<vmem>>, vector<2x1x32xf32>,
    %39 = vector.extract_strided_slice %10 {offsets = [0, 3, 0], sizes = [2, 1, 32], strides = [1, 1, 1]} : vector<2x8x32xf32> to vector<2x1x32xf32>
    %40 = vector.shape_cast %39 : vector<2x1x32xf32> to vector<2x32xf32>
    %c0_25 = arith.constant 0 : index
    %c0_26 = arith.constant 0 : index
    %41 = vector.load %arg4[%c0_25, %c0_26] : memref<32x32xf32, #tpu.memory_space<vmem>>, vector<32x32xf32>
    %cst_27 = arith.constant dense<0.000000e+00> : vector<2x32xf32>
    %42 = tpu.matmul %35, %41, %cst_27 {dimension_numbers = #tpu.dot_dimension_numbers<[1], [0], [0], [1], [0, 0, 1, 1], [], []>} : vector<2x32xf32>, vector<32x32xf32>, vector<2x32xf32> -> vector<2x32xf32>
    %43 = arith.addf %40, %42 : vector<2x32xf32>
    %44 = math.tanh %43 : vector<2x32xf32>
    %c0_28 = arith.constant 0 : index
    %c3 = arith.constant 3 : index
    %c0_29 = arith.constant 0 : index
    %45 = vector.load %arg9[%c0_28, %c3, %c0_29] : memref<2x8x32xf32, #tpu.memory_space<vmem>>, vector<2x1x32xf32>
    %46 = vector.shape_cast %45 : vector<2x1x32xf32> to vector<2x32xf32>
    %47 = vector.shape_cast %44 : vector<2x32xf32> to vector<2x1x32xf32>
    tpu.vector_store %arg9[%c0_28, %c3, %c0_29], %47 {strides = array<i32>} : memref<2x8x32xf32, #tpu.memory_space<vmem>>, vector<2x1x32xf32>,
    %48 = vector.extract_strided_slice %10 {offsets = [0, 4, 0], sizes = [2, 1, 32], strides = [1, 1, 1]} : vector<2x8x32xf32> to vector<2x1x32xf32>
    %49 = vector.shape_cast %48 : vector<2x1x32xf32> to vector<2x32xf32>
    %c0_30 = arith.constant 0 : index
    %c0_31 = arith.constant 0 : index
    %50 = vector.load %arg4[%c0_30, %c0_31] : memref<32x32xf32, #tpu.memory_space<vmem>>, vector<32x32xf32>
    %cst_32 = arith.constant dense<0.000000e+00> : vector<2x32xf32>
    %51 = tpu.matmul %44, %50, %cst_32 {dimension_numbers = #tpu.dot_dimension_numbers<[1], [0], [0], [1], [0, 0, 1, 1], [], []>} : vector<2x32xf32>, vector<32x32xf32>, vector<2x32xf32> -> vector<2x32xf32>
    %52 = arith.addf %49, %51 : vector<2x32xf32>
    %53 = math.tanh %52 : vector<2x32xf32>
    %c0_33 = arith.constant 0 : index
    %c4 = arith.constant 4 : index
    %c0_34 = arith.constant 0 : index
    %54 = vector.load %arg9[%c0_33, %c4, %c0_34] : memref<2x8x32xf32, #tpu.memory_space<vmem>>, vector<2x1x32xf32>
    %55 = vector.shape_cast %54 : vector<2x1x32xf32> to vector<2x32xf32>
    %56 = vector.shape_cast %53 : vector<2x32xf32> to vector<2x1x32xf32>
    tpu.vector_store %arg9[%c0_33, %c4, %c0_34], %56 {strides = array<i32>} : memref<2x8x32xf32, #tpu.memory_space<vmem>>, vector<2x1x32xf32>,
    %57 = vector.extract_strided_slice %10 {offsets = [0, 5, 0], sizes = [2, 1, 32], strides = [1, 1, 1]} : vector<2x8x32xf32> to vector<2x1x32xf32>
    %58 = vector.shape_cast %57 : vector<2x1x32xf32> to vector<2x32xf32>
    %c0_35 = arith.constant 0 : index
    %c0_36 = arith.constant 0 : index
    %59 = vector.load %arg4[%c0_35, %c0_36] : memref<32x32xf32, #tpu.memory_space<vmem>>, vector<32x32xf32>
    %cst_37 = arith.constant dense<0.000000e+00> : vector<2x32xf32>
    %60 = tpu.matmul %53, %59, %cst_37 {dimension_numbers = #tpu.dot_dimension_numbers<[1], [0], [0], [1], [0, 0, 1, 1], [], []>} : vector<2x32xf32>, vector<32x32xf32>, vector<2x32xf32> -> vector<2x32xf32>
    %61 = arith.addf %58, %60 : vector<2x32xf32>
    %62 = math.tanh %61 : vector<2x32xf32>
    %c0_38 = arith.constant 0 : index
    %c5 = arith.constant 5 : index
    %c0_39 = arith.constant 0 : index
    %63 = vector.load %arg9[%c0_38, %c5, %c0_39] : memref<2x8x32xf32, #tpu.memory_space<vmem>>, vector<2x1x32xf32>
    %64 = vector.shape_cast %63 : vector<2x1x32xf32> to vector<2x32xf32>
    %65 = vector.shape_cast %62 : vector<2x32xf32> to vector<2x1x32xf32>
    tpu.vector_store %arg9[%c0_38, %c5, %c0_39], %65 {strides = array<i32>} : memref<2x8x32xf32, #tpu.memory_space<vmem>>, vector<2x1x32xf32>,
    %66 = vector.extract_strided_slice %10 {offsets = [0, 6, 0], sizes = [2, 1, 32], strides = [1, 1, 1]} : vector<2x8x32xf32> to vector<2x1x32xf32>
    %67 = vector.shape_cast %66 : vector<2x1x32xf32> to vector<2x32xf32>
    %c0_40 = arith.constant 0 : index
    %c0_41 = arith.constant 0 : index
    %68 = vector.load %arg4[%c0_40, %c0_41] : memref<32x32xf32, #tpu.memory_space<vmem>>, vector<32x32xf32>
    %cst_42 = arith.constant dense<0.000000e+00> : vector<2x32xf32>
    %69 = tpu.matmul %62, %68, %cst_42 {dimension_numbers = #tpu.dot_dimension_numbers<[1], [0], [0], [1], [0, 0, 1, 1], [], []>} : vector<2x32xf32>, vector<32x32xf32>, vector<2x32xf32> -> vector<2x32xf32>
    %70 = arith.addf %67, %69 : vector<2x32xf32>
    %71 = math.tanh %70 : vector<2x32xf32>
    %c0_43 = arith.constant 0 : index
    %c6 = arith.constant 6 : index
    %c0_44 = arith.constant 0 : index
    %72 = vector.load %arg9[%c0_43, %c6, %c0_44] : memref<2x8x32xf32, #tpu.memory_space<vmem>>, vector<2x1x32xf32>
    %73 = vector.shape_cast %72 : vector<2x1x32xf32> to vector<2x32xf32>
    %74 = vector.shape_cast %71 : vector<2x32xf32> to vector<2x1x32xf32>
    tpu.vector_store %arg9[%c0_43, %c6, %c0_44], %74 {strides = array<i32>} : memref<2x8x32xf32, #tpu.memory_space<vmem>>, vector<2x1x32xf32>,
    %75 = vector.extract_strided_slice %10 {offsets = [0, 7, 0], sizes = [2, 1, 32], strides = [1, 1, 1]} : vector<2x8x32xf32> to vector<2x1x32xf32>
    %76 = vector.shape_cast %75 : vector<2x1x32xf32> to vector<2x32xf32>
    %c0_45 = arith.constant 0 : index
    %c0_46 = arith.constant 0 : index
    %77 = vector.load %arg4[%c0_45, %c0_46] : memref<32x32xf32, #tpu.memory_space<vmem>>, vector<32x32xf32>
    %cst_47 = arith.constant dense<0.000000e+00> : vector<2x32xf32>
    %78 = tpu.matmul %71, %77, %cst_47 {dimension_numbers = #tpu.dot_dimension_numbers<[1], [0], [0], [1], [0, 0, 1, 1], [], []>} : vector<2x32xf32>, vector<32x32xf32>, vector<2x32xf32> -> vector<2x32xf32>
    %79 = arith.addf %76, %78 : vector<2x32xf32>
    %80 = math.tanh %79 : vector<2x32xf32>
    %c0_48 = arith.constant 0 : index
    %c7 = arith.constant 7 : index
    %c0_49 = arith.constant 0 : index
    %81 = vector.load %arg9[%c0_48, %c7, %c0_49] : memref<2x8x32xf32, #tpu.memory_space<vmem>>, vector<2x1x32xf32>
    %82 = vector.shape_cast %81 : vector<2x1x32xf32> to vector<2x32xf32>
    %83 = vector.shape_cast %80 : vector<2x32xf32> to vector<2x1x32xf32>
    tpu.vector_store %arg9[%c0_48, %c7, %c0_49], %83 {strides = array<i32>} : memref<2x8x32xf32, #tpu.memory_space<vmem>>, vector<2x1x32xf32>,
    %c0_50 = arith.constant 0 : index
    %c0_51 = arith.constant 0 : index
    %84 = vector.load %arg8[%c0_50, %c0_51] : memref<2x32xf32, #tpu.memory_space<vmem>>, vector<2x32xf32>
    tpu.vector_store %arg8[%c0_50, %c0_51], %80 {strides = array<i32>} : memref<2x32xf32, #tpu.memory_space<vmem>>, vector<2x32xf32>,
    %c0_52 = arith.constant 0 : index
    %c0_53 = arith.constant 0 : index
    %c0_54 = arith.constant 0 : index
    %85 = vector.load %arg9[%c0_52, %c0_53, %c0_54] : memref<2x8x32xf32, #tpu.memory_space<vmem>>, vector<2x8x32xf32>
    %86 = vector.shape_cast %85 : vector<2x8x32xf32> to vector<16x32xf32>
    %c0_55 = arith.constant 0 : index
    %c0_56 = arith.constant 0 : index
    %87 = vector.load %arg5[%c0_55, %c0_56] : memref<32x8xf32, #tpu.memory_space<vmem>>, vector<32x8xf32>
    %cst_57 = arith.constant dense<0.000000e+00> : vector<16x8xf32>
    %88 = tpu.matmul %86, %87, %cst_57 {dimension_numbers = #tpu.dot_dimension_numbers<[1], [0], [0], [1], [0, 0, 1, 1], [], []>} : vector<16x32xf32>, vector<32x8xf32>, vector<16x8xf32> -> vector<16x8xf32>
    %c0_58 = arith.constant 0 : index
    %c0_59 = arith.constant 0 : index
    %89 = vector.load %arg6[%c0_58, %c0_59] : memref<1x8xf32, #tpu.memory_space<vmem>>, vector<1x8xf32>
    %90 = vector.broadcast %89 : vector<1x8xf32> to vector<16x8xf32>
    %91 = arith.addf %88, %90 : vector<16x8xf32>
    %92 = vector.shape_cast %91 : vector<16x8xf32> to vector<2x8x8xf32>
    %c0_60 = arith.constant 0 : index
    %c0_61 = arith.constant 0 : index
    %c0_62 = arith.constant 0 : index
    %93 = vector.load %arg7[%c0_60, %c0_61, %c0_62] : memref<2x8x8xf32, #tpu.memory_space<vmem>>, vector<2x8x8xf32>
    tpu.vector_store %arg7[%c0_60, %c0_61, %c0_62], %92 {strides = array<i32>} : memref<2x8x8xf32, #tpu.memory_space<vmem>>, vector<2x8x8xf32>,
    return
  }
  func.func @transform_0(%arg0: i32) -> (i32, i32, i32) {
    %c0_i32 = arith.constant 0 : i32
    %c0_i32_0 = arith.constant 0 : i32
    %c0_i32_1 = arith.constant 0 : i32
    return %c0_i32, %arg0, %c0_i32_0 : i32, i32, i32
  }
  func.func @transform_1(%arg0: i32) -> (i32, i32) {
    %c0_i32 = arith.constant 0 : i32
    %c0_i32_0 = arith.constant 0 : i32
    %c0_i32_1 = arith.constant 0 : i32
    return %c0_i32, %c0_i32_0 : i32, i32
  }
  func.func @transform_2(%arg0: i32) -> (i32, i32) {
    %c0_i32 = arith.constant 0 : i32
    %c0_i32_0 = arith.constant 0 : i32
    %c0_i32_1 = arith.constant 0 : i32
    return %c0_i32, %c0_i32_0 : i32, i32
  }
  func.func @transform_3(%arg0: i32) -> (i32, i32) {
    %c0_i32 = arith.constant 0 : i32
    %c0_i32_0 = arith.constant 0 : i32
    %c0_i32_1 = arith.constant 0 : i32
    return %c0_i32, %c0_i32_0 : i32, i32
  }
  func.func @transform_4(%arg0: i32) -> (i32, i32) {
    %c0_i32 = arith.constant 0 : i32
    %c0_i32_0 = arith.constant 0 : i32
    %c0_i32_1 = arith.constant 0 : i32
    return %c0_i32, %c0_i32_0 : i32, i32
  }
  func.func @transform_5(%arg0: i32) -> (i32, i32) {
    %c0_i32 = arith.constant 0 : i32
    %c0_i32_0 = arith.constant 0 : i32
    %c0_i32_1 = arith.constant 0 : i32
    return %c0_i32, %c0_i32_0 : i32, i32
  }
  func.func @transform_6(%arg0: i32) -> (i32, i32, i32) {
    %c0_i32 = arith.constant 0 : i32
    %c0_i32_0 = arith.constant 0 : i32
    %c0_i32_1 = arith.constant 0 : i32
    return %c0_i32, %arg0, %c0_i32_0 : i32, i32, i32
  }
}

</mosaic_0001>

<bundles_post_ra>
// kernel: rnn_forward.1
= control target key start
LH: loop header
LB: loop body
LE: loop exit
PB: predicated region body
PF: predicated region fallthrough
CT: control target
= control target key end

     0   :  { %11 = vsyncpa [#allocation5], 0  ;;  %s1517_s0 = inlined_call_operand.vmem [shape: f32[2,8,16], index: 0, kind: input, shape index: {}]   ;;  %s1518_s1 = inlined_call_operand.hbm [shape: f32[16,32], index: 1, kind: input, shape index: {}]   ;;  %s1519_s2 = inlined_call_operand.vmem [shape: f32[1,32], index: 2, kind: input, shape index: {}]   ;;  %s1520_s3 = inlined_call_operand.vmem [shape: f32[32,32], index: 3, kind: input, shape index: {}]   ;;  %s1521_s4 = inlined_call_operand.vmem [shape: f32[32,8], index: 4, kind: input, shape index: {}]   ;;  %s1522_s5 = inlined_call_operand.vmem [shape: f32[1,8], index: 5, kind: input, shape index: {}]   ;;  %s1523_s6 = inlined_call_operand.hbm [shape: f32[2,8,8], index: 6, kind: output, shape index: {}]  }
   0x1   :  { %12 = vsyncpa [#allocation6], 0  ;;  %s1314_s21 = smov [#allocation4]   ;;  %s1266_s25 = scalar_lea.hbm %s1518_s1, 256 }
   0x2   :  { %s20_s22 = sshll.u32 %s1314_s21, 4  ;;  %p1267_p0 = scmp.ne.s32.totalorder %s1518_s1, %s1266_s25  ;;  %s21_s22 = int_to_ptr.vmem [resolvable:$true] %s20_s22 }
   0x3   :  { %p1270_p1 = scmp.lt.u32.totalorder %s1266_s25, %s1518_s1 }
   0x5   :  { %p1272_p2 = pnand %p1270_p1, %p1267_p0 }
   0x7   :  { %1275 = shalt.err (!%p1272_p2)
}
   0x8   :  { %s1276_s30 = scalar_lea.vmem %s21_s22, 256  ;;  %p1281_p4 = scmp.lt.s32.totalorder %s21_s22, %s21_s22 }
   0x9   :  { %p1277_p3 = scmp.ne.s32.totalorder %s21_s22, %s1276_s30  ;;  %p1282_p5 = scmp.lt.s32.totalorder %s1276_s30, %s1276_s30 }
   0xb   :  { %p1283_p6 = por %p1282_p5, %p1281_p4 }
   0xd   :  { %p1284_p7 = pnand %p1283_p6, %p1277_p3 }
   0xf   :  { %1287 = shalt.err (!%p1284_p7)
}
  0x10   :  { %s1315_s7 = smov 128   ;;  %s1316_s8 = smov 8  }
  0x11   :  { %26 = dma.hbm_to_vmem [thread:$0]  %s1518_s1, 256, %s21_s22, [#allocation5], %s1315_s7, %s1315_s7, %s1316_s8  }
  0x12   :  { %1310 = dma.done.wait [#allocation5], 256  }
  0x13   :  { %1311 = vsyncadd [#allocation5], 4294967040  ;;  %v1317_v0 = vmov 0.0|0.0   ;;  %vm1318_vm0 = vmmov 0   ;;  %v1319_v1 = vmov 0.0   ;;  %vm42_vm1 = vcmask 254976  }
  0x14   :  { %1171 = vmatprep.subr.bf16.mxu1 %v1317_v0  ;;  %1076 = vmatprep.mubr.msk.f32.mxu1 %vm1318_vm0, %v1319_v1  ;;  %43 = vst.msk [vmem:[#allocation2] sm:$0x3] %vm42_vm1, %v1319_v1  ;;  %vm55_vm2 = vcmask 130048   ;;  %v46_v2 = vld [vmem:[#allocation4] sm:$0xff]  ;;  %v47_v3 = vld [vmem:[#allocation4 + $0x8] sm:$0xff]  ;;  %v139_v6 = vld [vmem:[%s1520_s3 + $0x8] sm:$0xff] }
  0x15   :  { %v138_v4 = vld [vmem:[%s1520_s3] sm:$0xff]  ;;  %v1167_v5 = vpack.c.bf16 %v47_v3, %v46_v2  ;;  %v140_v9 = vld [vmem:[%s1520_s3 + $0x10] sm:$0xff]  ;;  %v141_v10 = vld [vmem:[%s1520_s3 + $0x18] sm:$0xff]  ;;  %vm142_vm3 = vcmask 261120   ;;  %vm224_vm4 = vcmask 253952   ;;  %vm234_vm5 = vcmask 1041409  }
  0x16   :  { %v44_v7 = vld [vmem:[%s1517_s0] sm:$0xff]  ;;  %v1384_v8 = vpack.c.bf16 %v139_v6, %v138_v4  ;;  %v45_v11 = vld [vmem:[%s1517_s0 + $0x8] sm:$0xff]  ;;  %v1397_v12 = vpack.c.bf16 %v141_v10, %v140_v9  ;;  %vm316_vm6 = vcmask 254977   ;;  %vm408_vm7 = vcmask 256002   ;;  %s1320_s30 = smov [#allocation7]  }
  0x17   :  { %1065 = vmatprep.mubr.msk.f32.mxu0 %vm55_vm2, %v44_v7  ;;  %1168 = vmatprep.subr.bf16.mxu0 %v1167_v5  ;;  %v997_v14 = vld [vmem:[%s1519_s2] ss:$0 sm:$0xff]  ;;  %vm501_vm8 = vcmask 257027   ;;  %vm594_vm9 = vcmask 258052   ;;  %vm687_vm10 = vcmask 259077   ;;  %vm780_vm11 = vcmask 260102  }
  0x18   :  { %1173 = vmatpush3.bf16.msra.mxu1 %v1384_v8  ;;  %1170 = vmatpush3.bf16.msra.mxu0 %v1167_v5  ;;  %vm873_vm12 = vcmask 261127   ;;  %s985_s9 = sshll.u32 %s1320_s30, 4  ;;  %vm977_vm13 = vcmask 64512   ;;  %s986_s9 = int_to_ptr.vmem [resolvable:$true] %s985_s9 }
  0x19   :  { %1174 = vmatprep.subr.bf16.mxu1 %v1317_v0  ;;  %1177 = vmatprep.subr.bf16.mxu0 %v1317_v0  ;;  %s1288_s10 = scalar_lea.vmem %s986_s9, 256  ;;  %p1293_p9 = scmp.lt.s32.totalorder %s986_s9, %s986_s9 }
  0x1a   :  { %p1289_p8 = scmp.ne.s32.totalorder %s986_s9, %s1288_s10  ;;  %p1294_p10 = scmp.lt.s32.totalorder %s1288_s10, %s1288_s10 }
  0x1b   :  { %1066 = vmatmul.mubr.msk.f32.vlgmr.msra.gmra.mrb[0].mxu0 %vm55_vm2, %v45_v11  ;;  %v137_v13 = vld [vmem:[#allocation2] sm:$0x3] }
  0x1c   :  { %1176 = vmatpush3.bf16.msra.mxu1 %v1397_v12  ;;  %1179 = vmatpush3.bf16.msra.mxu0 %v1384_v8  ;;  %p1295_p11 = por %p1294_p10, %p1293_p9 }
  0x1d   :  { %1180 = vmatprep.subr.bf16.mxu0 %v1317_v0  ;;  %1087 = vmatprep.mubr.msk.f32.mxu0 %vm1318_vm0, %v1319_v1 }
  0x1e   :  { %1183 = vmatprep.subr.bf16.mxu1 %v1317_v0  ;;  %p1296_p12 = pnand %p1295_p11, %p1289_p8 }
  0x1f   :  { %1077 = vmatmul.mubr.msk.f32.vlgmr.msra.gmra.mrb[0].mxu1 %vm142_vm3, %v137_v13 }
  0x20   :  { %1182 = vmatpush3.bf16.msra.mxu0 %v1397_v12  ;;  %1185 = vmatpush3.bf16.msra.mxu1 %v1384_v8 }
  0x21   :  { %1186 = vmatprep.subr.bf16.mxu1 %v1317_v0  ;;  %1098 = vmatprep.mubr.msk.f32.mxu1 %vm1318_vm0, %v1319_v1 }
  0x22   :  { %1189 = vmatprep.subr.bf16.mxu0 %v1317_v0 }
  0x24   :  { %1188 = vmatpush3.bf16.msra.mxu1 %v1397_v12 }
  0x25   :  { %1195 = vmatprep.subr.bf16.mxu1 %v1317_v0 }
  0xee   :  { %v1067_v15 = vpop.f32.mrb[0].mxu0 }
  0xef   :  { %v128_v16 = vpop.f32.mrb[1].mxu0  ;;  %v1422_v18 = vadd.f32 %v1067_v15, %v997_v14 }
  0xf0   :  { %v1420_v17 = vadd.f32 %v997_v14, %v128_v16 }
  0xf2   :  { %v212_v19 = vpop.f32.mrb[0].mxu1 }
  0xf3   :  { %v217_v20 = vrot.slane %v212_v19, 1  ;;  %v220_v21 = vadd.f32 %v212_v19, %v1420_v17  ;;  %v1078_v22 = vpop.f32.mrb[1].mxu1 }
  0xf5   :  { %v221_v23 = vadd.f32 %v217_v20, %v1422_v18  ;;  %1234 = vtanh.f32 %v220_v21 }
  0xf7   :  { %1236 = vtanh.f32 %v221_v23 }
  0xff   :  { %v1235_v24 = vpop.eup %1234 }
 0x100   :  { %225 = vst.msk [vmem:[#allocation3] sm:$0x1] %vm224_vm4, %v1235_v24 }
 0x101   :  { %v1237_v25 = vpop.eup %1236 }
 0x102   :  { %226 = vst.msk [vmem:[#allocation3 + $0x8] sm:$0x1] %vm224_vm4, %v1237_v25  ;;  %v233_v26 = vrot.slane %v1237_v25, 7 }
 0x104   :  { %v235_v27 = vsel %vm234_vm5, %v233_v26, %v1235_v24 }
 0x105   :  { %1088 = vmatmul.mubr.msk.f32.vlgmr.msra.gmra.mrb[2].mxu0 %vm142_vm3, %v235_v27 }
 0x106   :  { %1191 = vmatpush3.bf16.msra.mxu0 %v1384_v8  ;;  %1109 = vmatprep.mubr.msk.f32.mxu0 %vm1318_vm0, %v1319_v1 }
 0x107   :  { %1192 = vmatprep.subr.bf16.mxu0 %v1317_v0 }
 0x10a   :  { %1194 = vmatpush3.bf16.msra.mxu0 %v1397_v12 }
 0x10b   :  { %1201 = vmatprep.subr.bf16.mxu0 %v1317_v0 }
 0x1d8   :  { %v304_v28 = vpop.f32.mrb[2].mxu0 }
 0x1d9   :  { %v309_v29 = vrot.slane %v304_v28, 7  ;;  %v313_v30 = vadd.f32 %v304_v28, %v1422_v18  ;;  %v1089_v31 = vpop.f32.mrb[3].mxu0 }
 0x1da   :  { %v886_v31 = vld [vmem:[%s1521_s4 + $0x8] sm:$0xff] }
 0x1db   :  { %v312_v32 = vadd.f32 %v309_v29, %v1420_v17  ;;  %1238 = vtanh.f32 %v313_v30  ;;  %v885_v30 = vld [vmem:[%s1521_s4] sm:$0xff] }
 0x1dd   :  { %1240 = vtanh.f32 %v312_v32  ;;  %v1219_v32 = vpack.c.bf16 %v886_v31, %v885_v30 }
 0x1e5   :  { %v1239_v33 = vpop.eup %1238 }
 0x1e6   :  { %318 = vst.msk [vmem:[#allocation3 + $0x8] sm:$0x2] %vm316_vm6, %v1239_v33 }
 0x1e7   :  { %v1241_v34 = vpop.eup %1240 }
 0x1e8   :  { %317 = vst.msk [vmem:[#allocation3] sm:$0x2] %vm316_vm6, %v1241_v34  ;;  %v325_v35 = vrot.slane %v1241_v34, 1  ;;  %v888_v34 = vld [vmem:[%s1521_s4 + $0x18] sm:$0xff] }
 0x1ea   :  { %v326_v36 = vsel %vm234_vm5, %v1239_v33, %v325_v35  ;;  %v887_v33 = vld [vmem:[%s1521_s4 + $0x10] sm:$0xff] }
 0x1eb   :  { %1099 = vmatmul.mubr.msk.f32.vlgmr.msra.gmra.mrb[2].mxu1 %vm142_vm3, %v326_v36  ;;  %v1223_v35 = vpack.c.bf16 %v888_v34, %v887_v33 }
 0x1ec   :  { %1197 = vmatpush3.bf16.msra.mxu1 %v1384_v8  ;;  %1120 = vmatprep.mubr.msk.f32.mxu1 %vm1318_vm0, %v1319_v1 }
 0x1ed   :  { %1198 = vmatprep.subr.bf16.mxu1 %v1317_v0 }
 0x1f0   :  { %1200 = vmatpush3.bf16.msra.mxu1 %v1397_v12 }
 0x1f1   :  { %1207 = vmatprep.subr.bf16.mxu1 %v1317_v0 }
 0x2be   :  { %v395_v37 = vpop.f32.mrb[2].mxu1 }
 0x2bf   :  { %v400_v38 = vrot.slane %v395_v37, 6  ;;  %v401_v39 = vrot.slane %v395_v37, 7  ;;  %v1100_v40 = vpop.f32.mrb[3].mxu1 }
 0x2c1   :  { %v404_v41 = vadd.f32 %v400_v38, %v1420_v17  ;;  %v405_v42 = vadd.f32 %v401_v39, %v1422_v18 }
 0x2c3   :  { %1242 = vtanh.f32 %v404_v41 }
 0x2c4   :  { %1244 = vtanh.f32 %v405_v42 }
 0x2cd   :  { %v1243_v43 = vpop.eup %1242 }
 0x2ce   :  { %v1245_v44 = vpop.eup %1244  ;;  %409 = vst.msk [vmem:[#allocation3] sm:$0x4] %vm408_vm7, %v1243_v43  ;;  %v417_v45 = vrot.slane %v1243_v43, 2 }
 0x2cf   :  { %410 = vst.msk [vmem:[#allocation3 + $0x8] sm:$0x4] %vm408_vm7, %v1245_v44  ;;  %v418_v46 = vrot.slane %v1245_v44, 1 }
 0x2d1   :  { %v419_v47 = vsel %vm234_vm5, %v418_v46, %v417_v45 }
 0x2d2   :  { %1110 = vmatmul.mubr.msk.f32.vlgmr.msra.gmra.mrb[4].mxu0 %vm142_vm3, %v419_v47 }
 0x2d3   :  { %1203 = vmatpush3.bf16.msra.mxu0 %v1384_v8  ;;  %1131 = vmatprep.mubr.msk.f32.mxu0 %vm1318_vm0, %v1319_v1 }
 0x2d4   :  { %1204 = vmatprep.subr.bf16.mxu0 %v1317_v0 }
 0x2d7   :  { %1206 = vmatpush3.bf16.msra.mxu0 %v1397_v12 }
 0x2d8   :  { %1213 = vmatprep.subr.bf16.mxu0 %v1317_v0 }
 0x3a5   :  { %v488_v48 = vpop.f32.mrb[4].mxu0 }
 0x3a6   :  { %v493_v49 = vrot.slane %v488_v48, 5  ;;  %v494_v50 = vrot.slane %v488_v48, 6  ;;  %v1111_v51 = vpop.f32.mrb[5].mxu0 }
 0x3a8   :  { %v497_v52 = vadd.f32 %v493_v49, %v1420_v17  ;;  %v498_v53 = vadd.f32 %v494_v50, %v1422_v18 }
 0x3aa   :  { %1246 = vtanh.f32 %v497_v52 }
 0x3ab   :  { %1248 = vtanh.f32 %v498_v53 }
 0x3b4   :  { %v1247_v54 = vpop.eup %1246 }
 0x3b5   :  { %v1249_v55 = vpop.eup %1248  ;;  %502 = vst.msk [vmem:[#allocation3] sm:$0x8] %vm501_vm8, %v1247_v54  ;;  %v510_v56 = vrot.slane %v1247_v54, 3 }
 0x3b6   :  { %503 = vst.msk [vmem:[#allocation3 + $0x8] sm:$0x8] %vm501_vm8, %v1249_v55  ;;  %v511_v57 = vrot.slane %v1249_v55, 2 }
 0x3b8   :  { %v512_v58 = vsel %vm234_vm5, %v511_v57, %v510_v56 }
 0x3b9   :  { %1121 = vmatmul.mubr.msk.f32.vlgmr.msra.gmra.mrb[4].mxu1 %vm142_vm3, %v512_v58 }
 0x3ba   :  { %1209 = vmatpush3.bf16.msra.mxu1 %v1384_v8  ;;  %1142 = vmatprep.mubr.msk.f32.mxu1 %vm1318_vm0, %v1319_v1 }
 0x3bb   :  { %1210 = vmatprep.subr.bf16.mxu1 %v1317_v0 }
 0x3be   :  { %1212 = vmatpush3.bf16.msra.mxu1 %v1397_v12 }
 0x3bf   :  { %1220 = vmatprep.subr.bf16.mxu1 %v1219_v32 }
 0x48c   :  { %v581_v59 = vpop.f32.mrb[4].mxu1 }
 0x48d   :  { %v586_v60 = vrot.slane %v581_v59, 4  ;;  %v587_v61 = vrot.slane %v581_v59, 5  ;;  %v1122_v62 = vpop.f32.mrb[5].mxu1 }
 0x48f   :  { %v590_v63 = vadd.f32 %v586_v60, %v1420_v17  ;;  %v591_v2 = vadd.f32 %v587_v61, %v1422_v18 }
 0x491   :  { %1250 = vtanh.f32 %v590_v63 }
 0x492   :  { %1252 = vtanh.f32 %v591_v2 }
 0x49b   :  { %v1251_v3 = vpop.eup %1250 }
 0x49c   :  { %v1253_v4 = vpop.eup %1252  ;;  %595 = vst.msk [vmem:[#allocation3] sm:$0x10] %vm594_vm9, %v1251_v3  ;;  %v603_v5 = vrot.slane %v1251_v3, 4 }
 0x49d   :  { %596 = vst.msk [vmem:[#allocation3 + $0x8] sm:$0x10] %vm594_vm9, %v1253_v4  ;;  %v604_v6 = vrot.slane %v1253_v4, 3 }
 0x49f   :  { %v605_v7 = vsel %vm234_vm5, %v604_v6, %v603_v5 }
 0x4a0   :  { %1132 = vmatmul.mubr.msk.f32.vlgmr.msra.gmra.mrb[6].mxu0 %vm142_vm3, %v605_v7 }
 0x4a1   :  { %1215 = vmatpush3.bf16.msra.mxu0 %v1384_v8  ;;  %1153 = vmatprep.mubr.msk.f32.mxu0 %vm1318_vm0, %v1319_v1 }
 0x4a2   :  { %1216 = vmatprep.subr.bf16.mxu0 %v1317_v0 }
 0x4a5   :  { %1218 = vmatpush3.bf16.msra.mxu0 %v1397_v12 }
 0x573   :  { %v674_v9 = vpop.f32.mrb[6].mxu0 }
 0x574   :  { %v679_v10 = vrot.slane %v674_v9, 3  ;;  %v680_v11 = vrot.slane %v674_v9, 4  ;;  %v1133_v13 = vpop.f32.mrb[7].mxu0 }
 0x576   :  { %v683_v14 = vadd.f32 %v679_v10, %v1420_v17  ;;  %v684_v15 = vadd.f32 %v680_v11, %v1422_v18 }
 0x578   :  { %1254 = vtanh.f32 %v683_v14 }
 0x579   :  { %1256 = vtanh.f32 %v684_v15 }
 0x582   :  { %v1255_v16 = vpop.eup %1254 }
 0x583   :  { %v1257_v8 = vpop.eup %1256  ;;  %688 = vst.msk [vmem:[#allocation3] sm:$0x20] %vm687_vm10, %v1255_v16  ;;  %v696_v19 = vrot.slane %v1255_v16, 5 }
 0x584   :  { %689 = vst.msk [vmem:[#allocation3 + $0x8] sm:$0x20] %vm687_vm10, %v1257_v8  ;;  %v697_v1 = vrot.slane %v1257_v8, 4 }
 0x586   :  { %v698_v0 = vsel %vm234_vm5, %v697_v1, %v696_v19 }
 0x587   :  { %1143 = vmatmul.mubr.msk.f32.vlgmr.msra.gmra.mrb[6].mxu1 %vm142_vm3, %v698_v0 }
 0x588   :  { %1222 = vmatpush3.bf16.msra.mxu1 %v1219_v32 }
 0x589   :  { %1224 = vmatprep.subr.bf16.mxu1 %v1223_v35 }
 0x58c   :  { %1226 = vmatpush3.bf16.msra.mxu1 %v1223_v35 }
 0x65a   :  { %v767_v12 = vpop.f32.mrb[6].mxu1 }
 0x65b   :  { %v772_v20 = vrot.slane %v767_v12, 2  ;;  %v773_v21 = vrot.slane %v767_v12, 3  ;;  %v1144_v22 = vpop.f32.mrb[7].mxu1 }
 0x65d   :  { %v776_v23 = vadd.f32 %v772_v20, %v1420_v17  ;;  %v777_v24 = vadd.f32 %v773_v21, %v1422_v18 }
 0x65f   :  { %1258 = vtanh.f32 %v776_v23 }
 0x660   :  { %1260 = vtanh.f32 %v777_v24 }
 0x669   :  { %v1259_v25 = vpop.eup %1258 }
 0x66a   :  { %v1261_v26 = vpop.eup %1260  ;;  %781 = vst.msk [vmem:[#allocation3] sm:$0x40] %vm780_vm11, %v1259_v25  ;;  %v789_v27 = vrot.slane %v1259_v25, 6 }
 0x66b   :  { %782 = vst.msk [vmem:[#allocation3 + $0x8] sm:$0x40] %vm780_vm11, %v1261_v26  ;;  %v790_v28 = vrot.slane %v1261_v26, 5 }
 0x66d   :  { %v791_v29 = vsel %vm234_vm5, %v790_v28, %v789_v27 }
 0x66e   :  { %1154 = vmatmul.mubr.msk.f32.vlgmr.msra.gmra.mrb[8].mxu0 %vm142_vm3, %v791_v29 }
 0x741   :  { %v860_v36 = vpop.f32.mrb[8].mxu0 }
 0x742   :  { %v865_v37 = vrot.slane %v860_v36, 1  ;;  %v866_v38 = vrot.slane %v860_v36, 2  ;;  %v1155_v39 = vpop.f32.mrb[9].mxu0 }
 0x744   :  { %v869_v40 = vadd.f32 %v865_v37, %v1420_v17  ;;  %v870_v41 = vadd.f32 %v866_v38, %v1422_v18  ;;  %v1008_v17 = vld [vmem:[%s1522_s5] ss:$0 sm:$0xff] }
 0x746   :  { %1262 = vtanh.f32 %v869_v40 }
 0x747   :  { %1264 = vtanh.f32 %v870_v41 }
 0x750   :  { %v1263_v42 = vpop.eup %1262 }
 0x751   :  { %v1265_v43 = vpop.eup %1264  ;;  %874 = vst.msk [vmem:[#allocation3] sm:$0x80] %vm873_vm12, %v1263_v42  ;;  %881 = vst.msk [vmem:[#allocation2 - $0x7] sm:$0x80] %vm873_vm12, %v1263_v42 }
 0x752   :  { %875 = vst.msk [vmem:[#allocation3 + $0x8] sm:$0x80] %vm873_vm12, %v1265_v43  ;;  %v878_v44 = vrot.slane %v1265_v43, 7 }
 0x754   :  { %882 = vst.msk [vmem:[#allocation2 + $0x1] sm:$0x1] %vm224_vm4, %v878_v44 }
 0x758   :  { %v883_v45 = vld [vmem:[#allocation3] sm:$0xff] }
 0x759   :  { %1164 = vmatprep.mubr.msk.f32.mxu1 %vm142_vm3, %v883_v45  ;;  %v884_v46 = vld [vmem:[#allocation3 + $0x8] sm:$0xff] }
 0x75a   :  { %1165 = vmatmul.mubr.msk.f32.vlgmr.msra.gmra.mrb[8].mxu1 %vm142_vm3, %v884_v46 }
 0x82d   :  { %v1166_v18 = vpop.f32.mrb[8].mxu1 }
 0x82e   :  { %v974_v47 = vadd.f32 %v1166_v18, %v1008_v17  ;;  %v968_v48 = vpop.f32.mrb[9].mxu1 }
 0x82f   :  { %v969_v49 = vadd.f32 %v1008_v17, %v968_v48 }
 0x830   :  { %979 = vst.msk [vmem:[#allocation7 + $0x8] sm:$0xff] %vm977_vm13, %v974_v47 }
 0x831   :  { %978 = vst.msk [vmem:[#allocation7] sm:$0xff] %vm977_vm13, %v969_v49 }
 0x832   :  { %1299 = shalt.err (!%p1296_p12)
}
 0x833   :  { %s1300_s5 = scalar_lea.hbm %s1523_s6, 256 }
 0x834   :  { %p1301_p13 = scmp.ne.s32.totalorder %s1523_s6, %s1300_s5  ;;  %p1304_p0 = scmp.lt.u32.totalorder %s1300_s5, %s1523_s6 }
 0x836   :  { %p1306_p1 = pnand %p1304_p0, %p1301_p13 }
 0x838   :  { %1309 = shalt.err (!%p1306_p1)
}
 0x839   :  { %991 = dma.vmem_to_hbm [thread:$0]  %s986_s9, 256, %s1523_s6, [#allocation6], %s1315_s7, %s1315_s7, %s1316_s8  }
 0x83a   :  { %1312 = dma.done.wait [#allocation6], 256  }
 0x83b   :  { %1313 = vsyncadd [#allocation6], 4294967040 }
 0x83c   :  { %995 = vsyncpa [#allocation5], 1 }
 0x83d   :  { %996 = vsyncpa [#allocation6], 1 }

</bundles_post_ra>
